<compile_context>
chip_gen: v6e
topology: v6e:2x2x1
jax: 0.10.0
libtpu: 0.0.40
codegen_flags: <defaults>
</compile_context>

<pallas_src>
import functools

import jax
import jax.numpy as jnp
from jax.experimental import pallas as pl
from jax.experimental.pallas import tpu as pltpu


def _round_up(v, m):
    return (v + m - 1) // m * m


def _global_attention_kernel(x_ref, bcol_ref, brow_ref, w_ref, b_ref, out_ref,
                             m_ref, acc_ref, eye_ref, *, num_graphs, h_dim,
                             matmul_dtype):
    i = pl.program_id(0)
    nt = pl.num_programs(0)
    B = num_graphs
    HP = w_ref.shape[1]
    NEG = jnp.float32(-3.0e38)      # big-negative sentinel (avoids inf-inf / 0*inf NaNs)

    @pl.when(i == 0)
    def _init():
        m_ref[...] = jnp.full(m_ref.shape, NEG, dtype=m_ref.dtype)
        acc_ref[...] = jnp.zeros_like(acc_ref)
        r = jax.lax.broadcasted_iota(jnp.int32, (B, B), 0)
        c = jax.lax.broadcasted_iota(jnp.int32, (B, B), 1)
        eye_ref[...] = (r == c).astype(jnp.float32)          # identity built once

    bcol = bcol_ref[...]                                      # [TN, 1] int32 (pad = -1)
    brow = brow_ref[...]                                      # [1, TN] int32 (pad = -1)
    valid = bcol >= 0                                         # [TN, 1]

    # Zero ragged-tail garbage rows BEFORE the matmul: the partial last x block is undefined
    # memory and could decode to Inf/NaN; zeroing here keeps every downstream value finite.
    xv = jnp.where(valid, x_ref[...], 0.0).astype(matmul_dtype)

    # Fused linear (single MXU pass):
    #   cols [0, H)  = nn(x) + b_nn
    #   col  H       = gate_nn(x)   (no bias: a per-node constant cancels in the softmax)
    #   col  H+1     = 1.0          ("ones" column -> softmax denominator for free)
    #   cols > H+1   = 0 padding
    hg = jnp.dot(xv, w_ref[...], preferred_element_type=jnp.float32) + b_ref[...]  # [TN,HP] f32

    lane1 = jax.lax.broadcasted_iota(jnp.int32, (1, HP), 1)                    # tiny [1,HP]
    gate = jnp.sum(jnp.where(lane1 == h_dim, hg, 0.0), axis=1, keepdims=True)  # [TN, 1]

    # One-hot segment masks in both orientations, built from tiny iotas via broadcast compares
    # (no transposes anywhere in the kernel).
    graphs_l = jax.lax.broadcasted_iota(jnp.int32, (1, B), 1)                  # [1, B]
    graphs_s = jax.lax.broadcasted_iota(jnp.int32, (B, 1), 0)                  # [B, 1]
    mask_nb = bcol == graphs_l                                                 # [TN, B]
    mask_bn = (brow == graphs_s).astype(jnp.float32)                           # [B, TN]

    # ---- online (running) per-graph max of the gate ----
    tile_max = jnp.max(jnp.where(mask_nb, gate, NEG), axis=0, keepdims=True)   # [1, B]
    m_old = m_ref[...]
    m_new = jnp.maximum(m_old, tile_max)
    m_ref[...] = m_new

    # Per-node gather of its graph's running max (lane reduce), then exp (<= 1, no overflow).
    node_max = jnp.sum(mask_nb.astype(jnp.float32) * m_new, axis=1, keepdims=True)  # [TN, 1]
    e = jnp.exp(gate - node_max)                                                     # [TN, 1]

    # Tile contribution: natural [B, TN] x [TN, HP] MXU matmul (no transposed contraction).
    # Column H+1 of hg (==1) makes this same matmul accumulate the softmax denominator.
    contrib = jnp.dot(mask_bn, e * hg, preferred_element_type=jnp.float32)     # [B, HP]

    # Rescale the previous accumulator by exp(m_old - m_new) per graph.  The identity pattern
    # lives in scratch; per tile we only apply the scale and do a tiny diag MXU matmul, which
    # maps the lane-indexed scale onto the sublane-indexed acc rows without any relayout.
    scale = jnp.exp(m_old - m_new)                                             # [1, B]
    rescale = eye_ref[...] * scale                                             # [B, B] diag
    acc_ref[...] = (jnp.dot(rescale, acc_ref[...], preferred_element_type=jnp.float32)
                    + contrib)

    @pl.when(i == nt - 1)
    def _finalize():
        acc = acc_ref[...]                                                     # [B, HP]
        denom = jnp.sum(jnp.where(lane1 == h_dim + 1, acc, 0.0), axis=1,
                        keepdims=True) + jnp.float32(1e-16)                    # [B, 1]
        inv = pl.reciprocal(denom, approx=True)     # EUP slot (nearly free)
        inv = inv * (2.0 - denom * inv)             # one Newton step -> ~f32 accuracy
        out_ref[...] = (acc * inv).astype(out_ref.dtype)       # lane-dense [B, HP] store


def global_attention(x, batch, w_gate, w_nn, b_nn, num_graphs, *,
                     tile_n=1024, matmul_dtype=jnp.bfloat16):
    """Global-attention pooling.  Weights are pre-transposed for `x @ W`.

    The gate bias is intentionally not an argument: a per-node constant added to the gate
    cancels exactly in the per-graph softmax (the reference in __main__ keeps it).
    """
    if tile_n % 128 != 0:
        raise ValueError("tile_n must be a multiple of 128")
    N, F = x.shape
    H = w_nn.shape[1]
    HP = _round_up(H + 2, 128)          # H features + gate column + ones column, lane padded
    tile_n = min(tile_n, _round_up(max(N, 1), 128))   # don't over-tile tiny inputs
    nt = pl.cdiv(N, tile_n)
    n_pad = nt * tile_n

    # Fused, lane-padded weight (matmul_dtype, bf16 by default -> ~2x MXU rate on v6e/v7x and
    # half the resident-weight DMA) and f32 bias (keeps the exact 1.0 ones-column + precise add).
    w_cat = jnp.zeros((F, HP), jnp.float32).at[:, :H].set(w_nn.astype(jnp.float32))
    w_cat = w_cat.at[:, H].set(w_gate[:, 0].astype(jnp.float32)).astype(matmul_dtype)
    b_cat = jnp.zeros((1, HP), jnp.float32).at[:, :H].set(
        jnp.reshape(b_nn, (1, H)).astype(jnp.float32))
    b_cat = b_cat.at[0, H + 1].set(1.0)

    # x is streamed UNPADDED (no extra HBM pad/copy pass over the dominant array).  Only the
    # tiny batch vector is padded: segment id -1 matches no graph and flags the garbage tail.
    b32 = batch.astype(jnp.int32)
    batch_col = jnp.full((n_pad, 1), -1, jnp.int32).at[:N, 0].set(b32)   # node-major column
    batch_row = jnp.full((1, n_pad), -1, jnp.int32).at[0, :N].set(b32)   # graph-major row

    kernel = functools.partial(_global_attention_kernel, num_graphs=num_graphs,
                               h_dim=H, matmul_dtype=matmul_dtype)

    # VMEM budget derived from the actual tile footprint (double-buffered x tile, resident
    # weight/bias/out/acc/eye, plus [TN,HP]/[TN,B] temporaries), capped at 48 MiB so the same
    # setting is safe on v7x (64 MiB physical) as well as v5e/v6e (128 MiB).
    est = (2 * tile_n * F * jnp.dtype(x.dtype).itemsize
           + F * HP * jnp.dtype(matmul_dtype).itemsize
           + 8 * tile_n * HP * 4
           + 4 * num_graphs * HP * 4
           + num_graphs * num_graphs * 4
           + 2 * tile_n * num_graphs * 4)
    vmem_limit = min(max(32 * 1024 * 1024, 2 * int(est)), 48 * 1024 * 1024)

    out_padded = pl.pallas_call(
        kernel,
        out_shape=jax.ShapeDtypeStruct((num_graphs, HP), jnp.float32),
        grid_spec=pltpu.PrefetchScalarGridSpec(
            num_scalar_prefetch=0,
            grid=(nt,),
            in_specs=[
                pl.BlockSpec((tile_n, F), lambda i: (i, 0)),   # x tile (streamed, ragged tail ok)
                pl.BlockSpec((tile_n, 1), lambda i: (i, 0)),   # batch, node-major column
                pl.BlockSpec((1, tile_n), lambda i: (0, i)),   # batch, graph-major row
                pl.BlockSpec((F, HP), lambda i: (0, 0)),       # fused weight (VMEM resident)
                pl.BlockSpec((1, HP), lambda i: (0, 0)),       # fused bias   (VMEM resident)
            ],
            out_specs=pl.BlockSpec((num_graphs, HP), lambda i: (0, 0)),  # resident output slab
            scratch_shapes=[
                pltpu.VMEM((1, num_graphs), jnp.float32),           # running per-graph max
                pltpu.VMEM((num_graphs, HP), jnp.float32),          # running [sum(e*h)|.|sum(e)]
                pltpu.VMEM((num_graphs, num_graphs), jnp.float32),  # identity (built once at i==0)
            ],
        ),
        compiler_params=pltpu.CompilerParams(
            # Running max / accumulator make the node axis a serial reduction on one TC.
            # A v7x 2-TC split (parallel leading axis, per-core partials, LSE merge) would
            # recover up to ~2x there for very large N; not needed at these sizes.
            dimension_semantics=("arbitrary",),
            vmem_limit_bytes=vmem_limit,
        ),
    )(x, batch_col, batch_row, w_cat, b_cat)

    return out_padded[:, :H]


def _reference(x, batch, w_gate, b_gate, w_nn, b_nn, num_graphs):
    """Pure-JAX reference (same math as the PyTorch module, gate bias included)."""
    gate = x @ w_gate + b_gate                                           # [N, 1]
    h = x @ w_nn + b_nn                                                  # [N, H]
    seg_max = jax.ops.segment_max(gate, batch, num_segments=num_graphs)
    gate = jnp.exp(gate - seg_max[batch])
    seg_sum = jax.ops.segment_sum(gate, batch, num_segments=num_graphs)
    alpha = gate / (seg_sum[batch] + 1e-16)
    return jax.ops.segment_sum(alpha * h, batch, num_segments=num_graphs)


if __name__ == "__main__":
    key = jax.random.PRNGKey(0)
    k_x, k_b, k_wg, k_bg, k_wn, k_bn = jax.random.split(key, 6)

    # nodes, in-features, out-features, graphs (N spans multiple tiles + a ragged tail)
    N, F, H, B = 300, 32, 32, 5

    x = jax.random.normal(k_x, (N, F), dtype=jnp.float32)
    batch = jnp.sort(jax.random.randint(k_b, (N,), 0, B, dtype=jnp.int32))

    bound = 1.0 / jnp.sqrt(jnp.float32(F))
    w_gate = jax.random.uniform(k_wg, (F, 1), jnp.float32, -bound, bound)
    b_gate = jax.random.uniform(k_bg, (1, 1), jnp.float32, -bound, bound)
    w_nn = jax.random.uniform(k_wn, (F, H), jnp.float32, -bound, bound)
    b_nn = jax.random.uniform(k_bn, (1, H), jnp.float32, -bound, bound)

    ref = _reference(x, batch, w_gate, b_gate, w_nn, b_nn, B)

    # tile_n=128 -> 3 node tiles (2 full + 1 ragged): exercises init / carry / finalize of the
    # online softmax and the unpadded-x partial-block masking.  Default bf16 compute path.
    out = global_attention(x, batch, w_gate, w_nn, b_nn, B, tile_n=128)
    out = jax.block_until_ready(out)
    assert out.shape == (B, H)
    assert jnp.allclose(out, ref, atol=1e-2, rtol=1e-2), "bf16 kernel mismatch vs reference"

    # Full-precision path for a tight numerical check of the kernel structure itself.
    out_f32 = global_attention(x, batch, w_gate, w_nn, b_nn, B, tile_n=128,
                               matmul_dtype=jnp.float32)
    out_f32 = jax.block_until_ready(out_f32)
    assert jnp.allclose(out_f32, ref, atol=5e-4, rtol=5e-4), "f32 kernel mismatch vs reference"

    print("KERNEL_OK")
</pallas_src>

<mosaic_0001>
module attributes {stable_mosaic.version = 11 : i64} {
  func.func @_global_attention_kernel(%arg0: i32, %arg1: memref<128x32xf32, #tpu.memory_space<vmem>>, %arg2: memref<128x1xi32, #tpu.memory_space<vmem>>, %arg3: memref<1x128xi32, #tpu.memory_space<vmem>>, %arg4: memref<32x128xbf16, #tpu.memory_space<vmem>>, %arg5: memref<1x128xf32, #tpu.memory_space<vmem>>, %arg6: memref<5x128xf32, #tpu.memory_space<vmem>>, %arg7: memref<1x5xf32, #tpu.memory_space<vmem>>, %arg8: memref<5x128xf32, #tpu.memory_space<vmem>>, %arg9: memref<5x5xf32, #tpu.memory_space<vmem>>) attributes {dimension_semantics = [#tpu.dimension_semantics<arbitrary>], iteration_bounds = array<i64: 3>, scalar_prefetch = 0 : i64, scratch_operands = 3 : i64, tpu.core_type = #tpu.core_type<tc>, window_params = [{transform_indices = @transform_0, window_bounds = array<i64: 128, 32>}, {transform_indices = @transform_1, window_bounds = array<i64: 128, 1>}, {transform_indices = @transform_2, window_bounds = array<i64: 1, 128>}, {pipeline_mode = #tpu.pipeline_mode<synchronous>, transform_indices = @transform_3, window_bounds = array<i64: 32, 128>}, {pipeline_mode = #tpu.pipeline_mode<synchronous>, transform_indices = @transform_4, window_bounds = array<i64: 1, 128>}, {pipeline_mode = #tpu.pipeline_mode<synchronous>, transform_indices = @transform_5, window_bounds = array<i64: 5, 128>}]} {
    %c0_i32 = arith.constant 0 : i32
    %0 = arith.cmpi eq, %arg0, %c0_i32 : i32
    %1 = arith.extui %0 : i1 to i32
    %cst = arith.constant -3.000000e+38 : f32
    %c0_i32_0 = arith.constant 0 : i32
    %2 = arith.cmpi ne, %1, %c0_i32_0 : i32
    scf.if %2 {
      %69 = vector.broadcast %cst : f32 to vector<1x5xf32>
      %c0_31 = arith.constant 0 : index
      %c0_32 = arith.constant 0 : index
      %70 = vector.load %arg7[%c0_31, %c0_32] : memref<1x5xf32, #tpu.memory_space<vmem>>, vector<1x5xf32>
      tpu.vector_store %arg7[%c0_31, %c0_32], %69 {strides = array<i32>} : memref<1x5xf32, #tpu.memory_space<vmem>>, vector<1x5xf32>,
      %cst_33 = arith.constant 0.000000e+00 : f32
      %71 = vector.broadcast %cst_33 : f32 to vector<5x128xf32>
      %c0_34 = arith.constant 0 : index
      %c0_35 = arith.constant 0 : index
      %72 = vector.load %arg8[%c0_34, %c0_35] : memref<5x128xf32, #tpu.memory_space<vmem>>, vector<5x128xf32>
      tpu.vector_store %arg8[%c0_34, %c0_35], %71 {strides = array<i32>} : memref<5x128xf32, #tpu.memory_space<vmem>>, vector<5x128xf32>,
      %73 = tpu.iota {dimensions = array<i32: 0>} : vector<5x5xi32>
      %74 = tpu.iota {dimensions = array<i32: 1>} : vector<5x5xi32>
      %75 = arith.cmpi eq, %73, %74 : vector<5x5xi32>
      %76 = arith.extui %75 : vector<5x5xi1> to vector<5x5xi32>
      %77 = arith.sitofp %76 : vector<5x5xi32> to vector<5x5xf32>
      %c0_36 = arith.constant 0 : index
      %c0_37 = arith.constant 0 : index
      %78 = vector.load %arg9[%c0_36, %c0_37] : memref<5x5xf32, #tpu.memory_space<vmem>>, vector<5x5xf32>
      tpu.vector_store %arg9[%c0_36, %c0_37], %77 {strides = array<i32>} : memref<5x5xf32, #tpu.memory_space<vmem>>, vector<5x5xf32>,
    } else {
    }
    %c0 = arith.constant 0 : index
    %c0_1 = arith.constant 0 : index
    %3 = vector.load %arg2[%c0, %c0_1] : memref<128x1xi32, #tpu.memory_space<vmem>>, vector<128x1xi32>
    %c0_2 = arith.constant 0 : index
    %c0_3 = arith.constant 0 : index
    %4 = vector.load %arg3[%c0_2, %c0_3] : memref<1x128xi32, #tpu.memory_space<vmem>>, vector<1x128xi32>
    %c0_i32_4 = arith.constant 0 : i32
    %5 = vector.broadcast %c0_i32_4 : i32 to vector<128x1xi32>
    %6 = arith.cmpi sge, %3, %5 : vector<128x1xi32>
    %c0_5 = arith.constant 0 : index
    %c0_6 = arith.constant 0 : index
    %7 = vector.load %arg1[%c0_5, %c0_6] : memref<128x32xf32, #tpu.memory_space<vmem>>, vector<128x32xf32>
    %cst_7 = arith.constant 0.000000e+00 : f32
    %8 = vector.shape_cast %6 : vector<128x1xi1> to vector<128x1xi1>
    %9 = vector.broadcast %8 : vector<128x1xi1> to vector<128x32xi1>
    %10 = vector.broadcast %cst_7 : f32 to vector<128x32xf32>
    %11 = arith.select %9, %7, %10 : vector<128x32xi1>, vector<128x32xf32>
    %12 = arith.truncf %11 : vector<128x32xf32> to vector<128x32xbf16>
    %c0_8 = arith.constant 0 : index
    %c0_9 = arith.constant 0 : index
    %13 = vector.load %arg4[%c0_8, %c0_9] : memref<32x128xbf16, #tpu.memory_space<vmem>>, vector<32x128xbf16>
    %cst_10 = arith.constant dense<0.000000e+00> : vector<128x128xf32>
    %14 = tpu.matmul %12, %13, %cst_10 {dimension_numbers = #tpu.dot_dimension_numbers<[1], [0], [0], [1], [0, 0, 1, 1], [], []>} : vector<128x32xbf16>, vector<32x128xbf16>, vector<128x128xf32> -> vector<128x128xf32>
    %c0_11 = arith.constant 0 : index
    %c0_12 = arith.constant 0 : index
    %15 = vector.load %arg5[%c0_11, %c0_12] : memref<1x128xf32, #tpu.memory_space<vmem>>, vector<1x128xf32>
    %16 = vector.broadcast %15 : vector<1x128xf32> to vector<128x128xf32>
    %17 = arith.addf %14, %16 : vector<128x128xf32>
    %18 = tpu.iota {dimensions = array<i32: 1>} : vector<1x128xi32>
    %c32_i32 = arith.constant 32 : i32
    %19 = vector.broadcast %c32_i32 : i32 to vector<1x128xi32>
    %20 = arith.cmpi eq, %18, %19 : vector<1x128xi32>
    %cst_13 = arith.constant 0.000000e+00 : f32
    %21 = vector.shape_cast %20 : vector<1x128xi1> to vector<1x128xi1>
    %22 = vector.broadcast %21 : vector<1x128xi1> to vector<128x128xi1>
    %23 = vector.broadcast %cst_13 : f32 to vector<128x128xf32>
    %24 = arith.select %22, %17, %23 : vector<128x128xi1>, vector<128x128xf32>
    %cst_14 = arith.constant dense<0.000000e+00> : vector<128xf32>
    %25 = vector.multi_reduction <add>, %24, %cst_14 [1] : vector<128x128xf32> to vector<128xf32>
    %26 = vector.shape_cast %25 : vector<128xf32> to vector<128x1xf32>
    %27 = tpu.iota {dimensions = array<i32: 1>} : vector<1x5xi32>
    %28 = tpu.iota {dimensions = array<i32: 0>} : vector<5x1xi32>
    %29 = vector.broadcast %3 : vector<128x1xi32> to vector<128x5xi32>
    %30 = vector.broadcast %27 : vector<1x5xi32> to vector<128x5xi32>
    %31 = arith.cmpi eq, %29, %30 : vector<128x5xi32>
    %32 = vector.broadcast %4 : vector<1x128xi32> to vector<5x128xi32>
    %33 = vector.broadcast %28 : vector<5x1xi32> to vector<5x128xi32>
    %34 = arith.cmpi eq, %32, %33 : vector<5x128xi32>
    %35 = arith.extui %34 : vector<5x128xi1> to vector<5x128xi32>
    %36 = arith.sitofp %35 : vector<5x128xi32> to vector<5x128xf32>
    %cst_15 = arith.constant -3.000000e+38 : f32
    %37 = vector.shape_cast %26 : vector<128x1xf32> to vector<128x1xf32>
    %38 = vector.broadcast %37 : vector<128x1xf32> to vector<128x5xf32>
    %39 = vector.broadcast %cst_15 : f32 to vector<128x5xf32>
    %40 = arith.select %31, %38, %39 : vector<128x5xi1>, vector<128x5xf32>
    %cst_16 = arith.constant dense<0xFF800000> : vector<5xf32>
    %41 = vector.multi_reduction <maximumf>, %40, %cst_16 [0] : vector<128x5xf32> to vector<5xf32>
    %42 = vector.shape_cast %41 : vector<5xf32> to vector<1x5xf32>
    %c0_17 = arith.constant 0 : index
    %c0_18 = arith.constant 0 : index
    %43 = vector.load %arg7[%c0_17, %c0_18] : memref<1x5xf32, #tpu.memory_space<vmem>>, vector<1x5xf32>
    %44 = arith.maximumf %43, %42 : vector<1x5xf32>
    %c0_19 = arith.constant 0 : index
    %c0_20 = arith.constant 0 : index
    %45 = vector.load %arg7[%c0_19, %c0_20] : memref<1x5xf32, #tpu.memory_space<vmem>>, vector<1x5xf32>
    tpu.vector_store %arg7[%c0_19, %c0_20], %44 {strides = array<i32>} : memref<1x5xf32, #tpu.memory_space<vmem>>, vector<1x5xf32>,
    %46 = arith.extui %31 : vector<128x5xi1> to vector<128x5xi32>
    %47 = arith.sitofp %46 : vector<128x5xi32> to vector<128x5xf32>
    %48 = vector.broadcast %44 : vector<1x5xf32> to vector<128x5xf32>
    %49 = arith.mulf %47, %48 : vector<128x5xf32>
    %cst_21 = arith.constant dense<0.000000e+00> : vector<128xf32>
    %50 = vector.multi_reduction <add>, %49, %cst_21 [1] : vector<128x5xf32> to vector<128xf32>
    %51 = vector.shape_cast %50 : vector<128xf32> to vector<128x1xf32>
    %52 = arith.subf %26, %51 : vector<128x1xf32>
    %53 = math.exp %52 : vector<128x1xf32>
    %54 = vector.broadcast %53 : vector<128x1xf32> to vector<128x128xf32>
    %55 = arith.mulf %54, %17 : vector<128x128xf32>
    %cst_22 = arith.constant dense<0.000000e+00> : vector<5x128xf32>
    %56 = tpu.matmul %36, %55, %cst_22 {dimension_numbers = #tpu.dot_dimension_numbers<[1], [0], [0], [1], [0, 0, 1, 1], [], []>} : vector<5x128xf32>, vector<128x128xf32>, vector<5x128xf32> -> vector<5x128xf32>
    %57 = arith.subf %43, %44 : vector<1x5xf32>
    %58 = math.exp %57 : vector<1x5xf32>
    %c0_23 = arith.constant 0 : index
    %c0_24 = arith.constant 0 : index
    %59 = vector.load %arg9[%c0_23, %c0_24] : memref<5x5xf32, #tpu.memory_space<vmem>>, vector<5x5xf32>
    %60 = vector.broadcast %58 : vector<1x5xf32> to vector<5x5xf32>
    %61 = arith.mulf %59, %60 : vector<5x5xf32>
    %c0_25 = arith.constant 0 : index
    %c0_26 = arith.constant 0 : index
    %62 = vector.load %arg8[%c0_25, %c0_26] : memref<5x128xf32, #tpu.memory_space<vmem>>, vector<5x128xf32>
    %cst_27 = arith.constant dense<0.000000e+00> : vector<5x128xf32>
    %63 = tpu.matmul %61, %62, %cst_27 {dimension_numbers = #tpu.dot_dimension_numbers<[1], [0], [0], [1], [0, 0, 1, 1], [], []>} : vector<5x5xf32>, vector<5x128xf32>, vector<5x128xf32> -> vector<5x128xf32>
    %64 = arith.addf %63, %56 : vector<5x128xf32>
    %c0_28 = arith.constant 0 : index
    %c0_29 = arith.constant 0 : index
    %65 = vector.load %arg8[%c0_28, %c0_29] : memref<5x128xf32, #tpu.memory_space<vmem>>, vector<5x128xf32>
    tpu.vector_store %arg8[%c0_28, %c0_29], %64 {strides = array<i32>} : memref<5x128xf32, #tpu.memory_space<vmem>>, vector<5x128xf32>,
    %c2_i32 = arith.constant 2 : i32
    %66 = arith.cmpi eq, %arg0, %c2_i32 : i32
    %67 = arith.extui %66 : i1 to i32
    %c0_i32_30 = arith.constant 0 : i32
    %68 = arith.cmpi ne, %67, %c0_i32_30 : i32
    scf.if %68 {
      %c0_31 = arith.constant 0 : index
      %c0_32 = arith.constant 0 : index
      %69 = vector.load %arg8[%c0_31, %c0_32] : memref<5x128xf32, #tpu.memory_space<vmem>>, vector<5x128xf32>
      %c33_i32 = arith.constant 33 : i32
      %70 = vector.broadcast %c33_i32 : i32 to vector<1x128xi32>
      %71 = arith.cmpi eq, %18, %70 : vector<1x128xi32>
      %cst_33 = arith.constant 0.000000e+00 : f32
      %72 = vector.shape_cast %71 : vector<1x128xi1> to vector<1x128xi1>
      %73 = vector.broadcast %72 : vector<1x128xi1> to vector<5x128xi1>
      %74 = vector.broadcast %cst_33 : f32 to vector<5x128xf32>
      %75 = arith.select %73, %69, %74 : vector<5x128xi1>, vector<5x128xf32>
      %cst_34 = arith.constant dense<0.000000e+00> : vector<5xf32>
      %76 = vector.multi_reduction <add>, %75, %cst_34 [1] : vector<5x128xf32> to vector<5xf32>
      %77 = vector.shape_cast %76 : vector<5xf32> to vector<5x1xf32>
      %cst_35 = arith.constant 1.000000e-16 : f32
      %78 = vector.broadcast %cst_35 : f32 to vector<5x1xf32>
      %79 = arith.addf %77, %78 : vector<5x1xf32>
      %80 = tpu.reciprocal %79 {approx = true} : vector<5x1xf32> -> vector<5x1xf32>
      %81 = arith.mulf %79, %80 : vector<5x1xf32>
      %cst_36 = arith.constant 2.000000e+00 : f32
      %82 = vector.broadcast %cst_36 : f32 to vector<5x1xf32>
      %83 = arith.subf %82, %81 : vector<5x1xf32>
      %84 = arith.mulf %80, %83 : vector<5x1xf32>
      %85 = vector.broadcast %84 : vector<5x1xf32> to vector<5x128xf32>
      %86 = arith.mulf %69, %85 : vector<5x128xf32>
      %c0_37 = arith.constant 0 : index
      %c0_38 = arith.constant 0 : index
      %87 = vector.load %arg6[%c0_37, %c0_38] : memref<5x128xf32, #tpu.memory_space<vmem>>, vector<5x128xf32>
      tpu.vector_store %arg6[%c0_37, %c0_38], %86 {strides = array<i32>} : memref<5x128xf32, #tpu.memory_space<vmem>>, vector<5x128xf32>,
    } else {
    }
    return
  }
  func.func @transform_0(%arg0: i32) -> (i32, i32) {
    %c0_i32 = arith.constant 0 : i32
    %c0_i32_0 = arith.constant 0 : i32
    return %arg0, %c0_i32 : i32, i32
  }
  func.func @transform_1(%arg0: i32) -> (i32, i32) {
    %c0_i32 = arith.constant 0 : i32
    %c0_i32_0 = arith.constant 0 : i32
    return %arg0, %c0_i32 : i32, i32
  }
  func.func @transform_2(%arg0: i32) -> (i32, i32) {
    %c0_i32 = arith.constant 0 : i32
    %c0_i32_0 = arith.constant 0 : i32
    return %c0_i32, %arg0 : i32, i32
  }
  func.func @transform_3(%arg0: i32) -> (i32, i32) {
    %c0_i32 = arith.constant 0 : i32
    %c0_i32_0 = arith.constant 0 : i32
    %c0_i32_1 = arith.constant 0 : i32
    return %c0_i32, %c0_i32_0 : i32, i32
  }
  func.func @transform_4(%arg0: i32) -> (i32, i32) {
    %c0_i32 = arith.constant 0 : i32
    %c0_i32_0 = arith.constant 0 : i32
    %c0_i32_1 = arith.constant 0 : i32
    return %c0_i32, %c0_i32_0 : i32, i32
  }
  func.func @transform_5(%arg0: i32) -> (i32, i32) {
    %c0_i32 = arith.constant 0 : i32
    %c0_i32_0 = arith.constant 0 : i32
    %c0_i32_1 = arith.constant 0 : i32
    return %c0_i32, %c0_i32_0 : i32, i32
  }
}

</mosaic_0001>

<bundles_post_ra>
// kernel: tpu_custom_call.1
= control target key start
LH: loop header
LB: loop body
LE: loop exit
PB: predicated region body
PF: predicated region fallthrough
CT: control target
= control target key end

     0   :  { %10 = vsyncpa [#allocation6], 0  ;;  %s1450_s18 = smov 0   ;;  %s2013_s0 = inlined_call_operand.vmem [shape: f32[300,32], index: 0, kind: input, shape index: {}]   ;;  %s2014_s1 = inlined_call_operand.vmem [shape: s32[384,1], index: 1, kind: input, shape index: {}]   ;;  %s2015_s2 = inlined_call_operand.vmem [shape: s32[1,384], index: 2, kind: input, shape index: {}]   ;;  %s2016_s3 = inlined_call_operand.vmem [shape: bf16[32,128], index: 3, kind: input, shape index: {}]   ;;  %s2017_s4 = inlined_call_operand.vmem [shape: f32[1,128], index: 4, kind: input, shape index: {}]   ;;  %s2018_s5 = inlined_call_operand.hbm [shape: f32[5,128], index: 5, kind: output, shape index: {}]  }
   0x1 LB: > { %s1456_s19 = sadd.s32 4294967295, %s1411_s18   ;;  %p1183_p0 = scmp.ge.s32.totalorder %s1411_s18, 1  ;;  %s1411_s18 = sphi %s1450_s18, %s16_s18  }
   0x2   : > { %p211_p1 = scmp.lt.s32.totalorder %s1411_s18, 4 }
   0x4   : > { %p212_p2 = pnand %p1183_p0, %p211_p1 }
   0x6   : > { %215 = sbr.rel (%p212_p2) target bundleno = 1148 (0x47c), region = 40 }
   0xb   : > { %s1184_s20 = sshll.u32 %s1456_s19, 4  ;;  %p266_p3 = scmp.lt.s32.totalorder %s1456_s19, 2 }
   0xc   : > { %p251_p4 = scmp.lt.s32.totalorder %s1184_s20, 37  ;;  %p261_p5 = scmp.lt.s32.totalorder %s1184_s20, 47 }
   0xd   : > { %s1463_s21 = scalar_select %p266_p3, %s1456_s19, 2 }
   0xe   : > { %s252_s22 = scalar_select %p251_p4, %s1184_s20, 37 }
   0xf   : > { %s2062_s20 = smov (!%p261_p5, %s1184_s20), 47  ;;  %s268_s26 = scalar_lea.vmem %s2015_s2, %s1463_s21 }
  0x10   : > { %s1185_s23 = sshll.u32 %s252_s22, 3  ;;  %s1187_s30 = sshll.u32 %s2062_s20, 3 }
  0x11   : > { %s1472_s29 = scalar_lea.vmem %s2013_s0, %s1185_s23  ;;  %s1477_s8 = scalar_lea.vmem %s2014_s1, %s1187_s30 }
  0x12   : > { %p1188_p6 = scmp.ne.s32.totalorder %s1456_s19, 0 }
  0x14   : > { %273 = sbr.rel (%p1188_p6) target bundleno = 32 (0x20), region = 44 }
  0x19   : > { %vm274_vm0 = vcmask 32768   ;;  %v277_v0 = vlaneseq  ;;  %v1413_v1 = vmov -3e+38   ;;  %v1414_v2 = vmov 0.0  }
  0x1a   : > { %275 = vst.msk [vmem:[#allocation2] sm:$0x1] %vm274_vm0, %v1413_v1  ;;  %276 = vst [vmem:[#allocation3] sm:$0x1f] %v1414_v2  ;;  %vm284_vm1 = vcmask 36864  }
  0x1b   : > { %v278_v3 = vshrl.u32 %v277_v0, 7  ;;  %v280_v4 = vand.u32 127, %v277_v0 }
  0x1d   : > { %vm281_vm2 = vcmp.eq.s32.totalorder %v278_v3, %v280_v4 }
  0x1e   : > { %v1189_v5 = vsel %vm281_vm2, 1.0, %v1414_v2 }
  0x1f   : > { %285 = vst.msk [vmem:[#allocation4] sm:$0x1f] %vm284_vm1, %v1189_v5 }
  0x20 PF: > { %v1481_v6 = vld [vmem:[%s1477_s8 + $0x10] sm:$0xff]  ;;  %v1484_v7 = vld [vmem:[%s1477_s8] sm:$0xff]  ;;  %v1487_v8 = vld [vmem:[%s1477_s8 + $0x18] sm:$0xff]  ;;  %v1415_v9 = vmov 0   ;;  %v2019_v41 = vmov 0.0   ;;  %p1222_p7 = scmp.ne.s32.totalorder %s1456_s19, 2 }
  0x21   : > { %1338 = vset.pattern.permute.xlu1 %v1415_v9  ;;  %1337 = vset.pattern.permute.xlu0 %v1415_v9  ;;  %vm305_vm3 = vcmp.ge.s32.totalorder %v1481_v6, 0  ;;  %vm303_vm4 = vcmp.ge.s32.totalorder %v1484_v7, 0  ;;  %vm306_vm5 = vcmp.ge.s32.totalorder %v1487_v8, 0  ;;  %v1495_v10 = vld [vmem:[%s1477_s8 + $0x8] sm:$0xff]  ;;  %v1504_v14 = vld [vmem:[%s1477_s8 + $0x20] sm:$0xff]  ;;  %v293_v17 = vld [vmem:[%s1477_s8 + $0x38] sm:$0xff] }
  0x22   : > { %v337_v11 = vsel %vm305_vm3, 1, %v1415_v9  ;;  %v335_v12 = vsel %vm303_vm4, 1, %v1415_v9  ;;  %vm304_vm6 = vcmp.ge.s32.totalorder %v1495_v10, 0  ;;  %v1501_v13 = vld [vmem:[%s1477_s8 + $0x28] sm:$0xff]  ;;  %v338_v15 = vsel %vm306_vm5, 1, %v1415_v9  ;;  %v292_v18 = vld [vmem:[%s1477_s8 + $0x30] sm:$0xff]  ;;  %1276 = vmatprep.subr.mxu1 %v2019_v41 }
  0x23   : > { %358 = vperm.xlu1 %1338, %v337_v11   ;;  %352 = vperm.xlu0 %1337, %v335_v12   ;;  %v336_v16 = vsel %vm304_vm6, 1, %v1415_v9  ;;  %vm308_vm7 = vcmp.ge.s32.totalorder %v1501_v13, 0  ;;  %vm307_vm8 = vcmp.ge.s32.totalorder %v1504_v14, 0  ;;  %vm310_vm9 = vcmp.ge.s32.totalorder %v293_v17, 0  ;;  %v295_v21 = vld [vmem:[%s1477_s8 + $0x48] sm:$0xff]  ;;  %v294_v23 = vld [vmem:[%s1477_s8 + $0x40] sm:$0xff] }
  0x24   : > { %v340_v19 = vsel %vm308_vm7, 1, %v1415_v9  ;;  %v339_v20 = vsel %vm307_vm8, 1, %v1415_v9  ;;  %vm309_vm10 = vcmp.ge.s32.totalorder %v292_v18, 0  ;;  %v1339_v22 = vld [vmem:[%s2016_s3 + $0x8] sm:$0xff]   ;;  %v1340_v24 = vld [vmem:[%s2016_s3] sm:$0xff]   ;;  %v342_v25 = vsel %vm310_vm9, 1, %v1415_v9 }
  0x25   : > { %v341_v26 = vsel %vm309_vm10, 1, %v1415_v9  ;;  %1256 = vmatprep.subr.bf16.mxu0 %v1339_v22  ;;  %vm312_vm11 = vcmp.ge.s32.totalorder %v295_v21, 0  ;;  %vm311_vm12 = vcmp.ge.s32.totalorder %v294_v23, 0  ;;  %v297_v27 = vld [vmem:[%s1477_s8 + $0x58] sm:$0xff]  ;;  %v296_v28 = vld [vmem:[%s1477_s8 + $0x50] sm:$0xff]  ;;  %v299_v31 = vld [vmem:[%s1477_s8 + $0x68] sm:$0xff] }
  0x26   : > { %1257 = vmatpush3.bf16.msra.mxu0 %v1339_v22  ;;  %v344_v29 = vsel %vm312_vm11, 1, %v1415_v9  ;;  %v343_v30 = vsel %vm311_vm12, 1, %v1415_v9  ;;  %vm314_vm13 = vcmp.ge.s32.totalorder %v297_v27, 0  ;;  %vm313_vm14 = vcmp.ge.s32.totalorder %v296_v28, 0  ;;  %v298_v32 = vld [vmem:[%s1477_s8 + $0x60] sm:$0xff]  ;;  %v1533_v35 = vld [vmem:[%s1477_s8 + $0x78] sm:$0xff] }
  0x27   : > { %361 = vperm.xlu1 %1338, %v338_v15   ;;  %355 = vperm.xlu0 %1337, %v336_v16   ;;  %v346_v33 = vsel %vm314_vm13, 1, %v1415_v9  ;;  %v345_v34 = vsel %vm313_vm14, 1, %v1415_v9  ;;  %vm316_vm15 = vcmp.ge.s32.totalorder %v299_v31, 0  ;;  %vm315_vm0 = vcmp.ge.s32.totalorder %v298_v32, 0  ;;  %v1536_v36 = vld [vmem:[%s1477_s8 + $0x70] sm:$0xff]  ;;  %v319_v45 = vld [vmem:[%s1472_s29] sm:$0xff] }
  0x28   : > { %1258 = vmatprep.subr.bf16.mxu0 %v1340_v24  ;;  %v348_v37 = vsel %vm316_vm15, 1, %v1415_v9  ;;  %v347_v38 = vsel %vm315_vm0, 1, %v1415_v9  ;;  %vm318_vm1 = vcmp.ge.s32.totalorder %v1533_v35, 0  ;;  %vm317_vm2 = vcmp.ge.s32.totalorder %v1536_v36, 0  ;;  %v321_v44 = vld [vmem:[%s1472_s29 + $0x10] sm:$0xff]  ;;  %v322_v46 = vld [vmem:[%s1472_s29 + $0x18] sm:$0xff] }
  0x29   : > { %v350_v39 = vsel %vm318_vm1, 1, %v1415_v9  ;;  %v349_v40 = vsel %vm317_vm2, 1, %v1415_v9  ;;  %v320_v47 = vld [vmem:[%s1472_s29 + $0x8] sm:$0xff]  ;;  %vm462_vm7 = vcmask 261120   ;;  %v323_v56 = vld [vmem:[%s1472_s29 + $0x20] sm:$0xff]  ;;  %v326_v63 = vld [vmem:[%s1472_s29 + $0x38] sm:$0xff] }
  0x2a   : > { %1259 = vmatpush3.bf16.msra.mxu0 %v1340_v24  ;;  %v324_v55 = vld [vmem:[%s1472_s29 + $0x28] sm:$0xff]  ;;  %v325_v0 = vld [vmem:[%s1472_s29 + $0x30] sm:$0xff] }
  0x2b   : > { %367 = vperm.xlu1 %1338, %v340_v19   ;;  %364 = vperm.xlu0 %1337, %v339_v20   ;;  %v332_v20 = vld [vmem:[%s1472_s29 + $0x68] sm:$0xff] }
  0x2f   : > { %373 = vperm.xlu1 %1338, %v342_v25   ;;  %370 = vperm.xlu0 %1337, %v341_v26  }
  0x33   : > { %379 = vperm.xlu1 %1338, %v344_v29   ;;  %376 = vperm.xlu0 %1337, %v343_v30  }
  0x37   : > { %385 = vperm.xlu1 %1338, %v346_v33   ;;  %382 = vperm.xlu0 %1337, %v345_v34   ;;  %v2021_v34 = vlaneseq }
  0x3b   : > { %391 = vperm.xlu1 %1338, %v348_v37   ;;  %388 = vperm.xlu0 %1337, %v347_v38   ;;  %v1576_v37 = vand.u32 127, %v2021_v34  ;;  %v1190_v38 = vld [vmem:[%s2017_s4] ss:$0 sm:$0xff] }
  0x3f   : > { %397 = vperm.xlu1 %1338, %v350_v39   ;;  %394 = vperm.xlu0 %1337, %v349_v40  }
  0x43   : > { %640 = vperm.xlu1 %1338, %v1484_v7   ;;  %643 = vperm.xlu0 %1337, %v1495_v10   ;;  %v327_v7 = vld [vmem:[%s1472_s29 + $0x40] sm:$0xff] }
  0x47   : > { %646 = vperm.xlu1 %1338, %v1481_v6   ;;  %652 = vperm.xlu0 %1337, %v1504_v14   ;;  %v328_v6 = vld [vmem:[%s1472_s29 + $0x48] sm:$0xff]  ;;  %v329_v14 = vld [vmem:[%s1472_s29 + $0x50] sm:$0xff] }
  0x4b   : > { %649 = vperm.xlu1 %1338, %v1487_v8   ;;  %658 = vperm.xlu0 %1337, %v292_v18  }
  0x4f   : > { %655 = vperm.xlu1 %1338, %v1501_v13   ;;  %664 = vperm.xlu0 %1337, %v294_v23   ;;  %v330_v13 = vld [vmem:[%s1472_s29 + $0x58] sm:$0xff] }
  0x53   : > { %661 = vperm.xlu1 %1338, %v293_v17   ;;  %670 = vperm.xlu0 %1337, %v296_v28   ;;  %v333_v28 = vld [vmem:[%s1472_s29 + $0x70] sm:$0xff] }
  0x57   : > { %667 = vperm.xlu1 %1338, %v295_v21   ;;  %676 = vperm.xlu0 %1337, %v298_v32   ;;  %v331_v21 = vld [vmem:[%s1472_s29 + $0x60] sm:$0xff] }
  0x5b   : > { %673 = vperm.xlu1 %1338, %v297_v27   ;;  %v334_v27 = vld [vmem:[%s1472_s29 + $0x78] sm:$0xff] }
  0x5f   : > { %679 = vperm.xlu1 %1338, %v299_v31  }
  0x9e   : > { %v359_v42 = vpop.permute.xlu1 %358  ;;  %v353_v43 = vpop.permute.xlu0 %352 }
  0x9f   : > { %vm401_vm3 = vcmp.eq.s32.totalorder %v359_v42, 1  ;;  %vm399_vm4 = vcmp.eq.s32.totalorder %v353_v43, 1 }
  0xa0   : > { %v417_v50 = vsel %vm401_vm3, %v321_v44, 0.0  ;;  %v415_v51 = vsel %vm399_vm4, %v319_v45, 0.0  ;;  %vm586_vm4 = vcmp.eq.s32.totalorder %v1576_v37, 32 }
  0xa2   : > { %v362_v48 = vpop.permute.xlu1 %361  ;;  %v356_v49 = vpop.permute.xlu0 %355 }
  0xa3   : > { %vm402_vm5 = vcmp.eq.s32.totalorder %v362_v48, 1  ;;  %vm400_vm6 = vcmp.eq.s32.totalorder %v356_v49, 1 }
  0xa4   : > { %v418_v52 = vsel %vm402_vm5, %v322_v46, 0.0  ;;  %v416_v53 = vsel %vm400_vm6, %v320_v47, 0.0 }
  0xa5   : > { %v432_v54 = vpack.c.bf16 %v418_v52, %v417_v50  ;;  %v431_v57 = vpack.c.bf16 %v416_v53, %v415_v51 }
  0xa6   : > { %v368_v58 = vpop.permute.xlu1 %367  ;;  %v365_v59 = vpop.permute.xlu0 %364 }
  0xa7   : > { %vm404_vm8 = vcmp.eq.s32.totalorder %v368_v58, 1  ;;  %vm403_vm9 = vcmp.eq.s32.totalorder %v365_v59, 1  ;;  %1260 = vmatprep.mubr.msk.bf16.mxu0 %vm462_vm7, %v431_v57 }
  0xa8   : > { %v420_v60 = vsel %vm404_vm8, %v324_v55, 0.0  ;;  %v419_v61 = vsel %vm403_vm9, %v323_v56, 0.0  ;;  %1261 = vmatmul.mubr.msk.bf16.vlgmr.msra.gmra.mxu0 %vm462_vm7, %v432_v54 }
  0xa9   : > { %v433_v62 = vpack.c.bf16 %v420_v60, %v419_v61 }
  0xaa   : > { %v374_v1 = vpop.permute.xlu1 %373  ;;  %v371_v2 = vpop.permute.xlu0 %370 }
  0xab   : > { %vm406_vm10 = vcmp.eq.s32.totalorder %v374_v1, 1  ;;  %vm405_vm11 = vcmp.eq.s32.totalorder %v371_v2, 1  ;;  %1264 = vmatprep.mubr.msk.bf16.mxu0 %vm462_vm7, %v433_v62 }
  0xac   : > { %v422_v3 = vsel %vm406_vm10, %v326_v63, 0.0  ;;  %v421_v4 = vsel %vm405_vm11, %v325_v0, 0.0  ;;  %vm726_vm10 = vcmask 39936  }
  0xad   : > { %v434_v5 = vpack.c.bf16 %v422_v3, %v421_v4 }
  0xae   : > { %v380_v8 = vpop.permute.xlu1 %379  ;;  %v377_v9 = vpop.permute.xlu0 %376 }
  0xaf   : > { %vm408_vm12 = vcmp.eq.s32.totalorder %v380_v8, 1  ;;  %vm407_vm13 = vcmp.eq.s32.totalorder %v377_v9, 1 }
  0xb0   : > { %v424_v10 = vsel %vm408_vm12, %v328_v6, 0.0  ;;  %v423_v11 = vsel %vm407_vm13, %v327_v7, 0.0  ;;  %1265 = vmatmul.mubr.msk.bf16.gmra.mxu0 %vm462_vm7, %v434_v5 }
  0xb1   : > { %v435_v12 = vpack.c.bf16 %v424_v10, %v423_v11 }
  0xb2   : > { %v386_v15 = vpop.permute.xlu1 %385  ;;  %v383_v16 = vpop.permute.xlu0 %382 }
  0xb3   : > { %vm410_vm14 = vcmp.eq.s32.totalorder %v386_v15, 1  ;;  %vm409_vm15 = vcmp.eq.s32.totalorder %v383_v16, 1  ;;  %1268 = vmatprep.mubr.msk.bf16.mxu0 %vm462_vm7, %v435_v12 }
  0xb4   : > { %v426_v17 = vsel %vm410_vm14, %v330_v13, 0.0  ;;  %v425_v18 = vsel %vm409_vm15, %v329_v14, 0.0 }
  0xb5   : > { %v436_v19 = vpack.c.bf16 %v426_v17, %v425_v18 }
  0xb6   : > { %v392_v22 = vpop.permute.xlu1 %391  ;;  %v389_v23 = vpop.permute.xlu0 %388 }
  0xb7   : > { %vm412_vm0 = vcmp.eq.s32.totalorder %v392_v22, 1  ;;  %vm411_vm1 = vcmp.eq.s32.totalorder %v389_v23, 1 }
  0xb8   : > { %v428_v24 = vsel %vm412_vm0, %v332_v20, 0.0  ;;  %v427_v25 = vsel %vm411_vm1, %v331_v21, 0.0  ;;  %1269 = vmatmul.mubr.msk.bf16.gmra.mxu0 %vm462_vm7, %v436_v19 }
  0xb9   : > { %v437_v26 = vpack.c.bf16 %v428_v24, %v427_v25 }
  0xba   : > { %v398_v29 = vpop.permute.xlu1 %397  ;;  %v395_v30 = vpop.permute.xlu0 %394 }
  0xbb   : > { %vm414_vm2 = vcmp.eq.s32.totalorder %v398_v29, 1  ;;  %vm413_vm3 = vcmp.eq.s32.totalorder %v395_v30, 1  ;;  %1272 = vmatprep.mubr.msk.bf16.mxu0 %vm462_vm7, %v437_v26 }
  0xbc   : > { %v430_v31 = vsel %vm414_vm2, %v334_v27, 0.0  ;;  %v429_v32 = vsel %vm413_vm3, %v333_v28, 0.0 }
  0xbd   : > { %v438_v33 = vpack.c.bf16 %v430_v31, %v429_v32 }
  0xbe   : > { %v1664_v24 = vpop.permute.xlu1 %640  ;;  %v1666_v25 = vpop.permute.xlu0 %643 }
  0xbf   : > { %vm2031_vm5 = vcmp.eq.s32.totalorder %v1664_v24, %v1576_v37  ;;  %vm688_vm6 = vcmp.eq.s32.totalorder %v1666_v25, %v1576_v37 }
  0xc0   : > { %1273 = vmatmul.mubr.msk.bf16.gmra.mxu0 %vm462_vm7, %v438_v33 }
  0xc2   : > { %v1668_v26 = vpop.permute.xlu1 %646  ;;  %v1670_v27 = vpop.permute.xlu0 %652 }
  0xc3   : > { %vm2034_vm7 = vcmp.eq.s32.totalorder %v1668_v26, %v1576_v37  ;;  %vm691_vm8 = vcmp.eq.s32.totalorder %v1670_v27, %v1576_v37 }
  0xc6   : > { %v1672_v28 = vpop.permute.xlu1 %649  ;;  %v1674_v29 = vpop.permute.xlu0 %658 }
  0xc7   : > { %vm690_vm9 = vcmp.eq.s32.totalorder %v1672_v28, %v1576_v37  ;;  %vm693_vm11 = vcmp.eq.s32.totalorder %v1674_v29, %v1576_v37 }
  0xca   : > { %v1676_v30 = vpop.permute.xlu1 %655  ;;  %v1678_v31 = vpop.permute.xlu0 %664 }
  0xcb   : > { %vm692_vm12 = vcmp.eq.s32.totalorder %v1676_v30, %v1576_v37  ;;  %vm695_vm13 = vcmp.eq.s32.totalorder %v1678_v31, %v1576_v37 }
  0xce   : > { %v1680_v32 = vpop.permute.xlu1 %661 }
  0xcf   : > { %vm694_vm14 = vcmp.eq.s32.totalorder %v1680_v32, %v1576_v37 }
 0x168   : > { %v1262_v39 = vpop.f32.mrf.mxu0 }
 0x169   : > { %v1582_v40 = vadd.f32 %v1262_v39, %v1190_v38 }
 0x16a   : > { %v521_v42 = vpop.f32.mrf.mxu0 }
 0x16b   : > { %2035 = vst [vmem:[#allocation8_spill] sm:$0xff] %v1582_v40  ;;  %v1584_v43 = vadd.f32 %v1190_v38, %v521_v42  ;;  %v591_v44 = vsel %vm586_vm4, %v1582_v40, 0.0 }
 0x16c   : > { %609 = vadd.xlane.f32.xlu0 %v591_v44  ;;  %v1263_v45 = vpop.f32.mrf.mxu0 }
 0x16d   : > { %2036 = vst [vmem:[#allocation9_spill] sm:$0xff] %v1584_v43  ;;  %v1589_v47 = vadd.f32 %v1263_v45, %v1190_v38  ;;  %v589_v49 = vsel %vm586_vm4, %v1584_v43, 0.0 }
 0x16e   : > { %v524_v46 = vpop.f32.mrf.mxu0 }
 0x16f   : > { %2037 = vst [vmem:[#allocation10_spill] sm:$0xff] %v1589_v47  ;;  %v1591_v48 = vadd.f32 %v1190_v38, %v524_v46  ;;  %v592_v54 = vsel %vm586_vm4, %v1589_v47, 0.0 }
 0x170   : > { %605 = vadd.xlane.f32.xlu0 %v589_v49  ;;  %v1266_v50 = vpop.f32.mrf.mxu0 }
 0x171   : > { %2038 = vst [vmem:[#allocation11_spill] sm:$0xff] %v1591_v48  ;;  %v1596_v51 = vadd.f32 %v1266_v50, %v1190_v38  ;;  %v590_v52 = vsel %vm586_vm4, %v1591_v48, 0.0 }
 0x172   : > { %607 = vadd.xlane.f32.xlu1 %v590_v52  ;;  %v537_v53 = vpop.f32.mrf.mxu0 }
 0x173   : > { %2039 = vst [vmem:[#allocation12_spill] sm:$0xff] %v1596_v51  ;;  %v1604_v56 = vadd.f32 %v1190_v38, %v537_v53  ;;  %v595_v58 = vsel %vm586_vm4, %v1596_v51, 0.0 }
 0x174   : > { %611 = vadd.xlane.f32.xlu0 %v592_v54  ;;  %v1267_v55 = vpop.f32.mrf.mxu0 }
 0x175   : > { %2040 = vst [vmem:[#allocation13_spill] sm:$0xff] %v1604_v56  ;;  %v1606_v57 = vadd.f32 %v1267_v55, %v1190_v38  ;;  %v593_v0 = vsel %vm586_vm4, %v1604_v56, 0.0 }
 0x176   : > { %617 = vadd.xlane.f32.xlu1 %v595_v58  ;;  %v540_v59 = vpop.f32.mrf.mxu0 }
 0x177   : > { %2041 = vst [vmem:[#allocation14_spill] sm:$0xff] %v1606_v57  ;;  %v1611_v60 = vadd.f32 %v1190_v38, %v540_v59  ;;  %v596_v61 = vsel %vm586_vm4, %v1606_v57, 0.0 }
 0x178   : > { %619 = vadd.xlane.f32.xlu0 %v596_v61  ;;  %v1270_v62 = vpop.f32.mrf.mxu0 }
 0x179   : > { %2042 = vst [vmem:[#allocation15_spill] sm:$0xff] %v1611_v60  ;;  %v1616_v63 = vadd.f32 %v1270_v62, %v1190_v38  ;;  %v594_v2 = vsel %vm586_vm4, %v1611_v60, 0.0 }
 0x17a   : > { %613 = vadd.xlane.f32.xlu1 %v593_v0  ;;  %v553_v1 = vpop.f32.mrf.mxu0 }
 0x17b   : > { %v1624_v4 = vadd.f32 %v1190_v38, %v553_v1  ;;  %v599_v6 = vsel %vm586_vm4, %v1616_v63, 0.0 }
 0x17c   : > { %615 = vadd.xlane.f32.xlu0 %v594_v2  ;;  %v1271_v3 = vpop.f32.mrf.mxu0 }
 0x17d   : > { %2043 = vst [vmem:[#allocation16_spill] sm:$0xff] %v1624_v4  ;;  %v1626_v5 = vadd.f32 %v1271_v3, %v1190_v38  ;;  %v597_v12 = vsel %vm586_vm4, %v1624_v4, 0.0 }
 0x17e   : > { %625 = vadd.xlane.f32.xlu1 %v599_v6  ;;  %v556_v7 = vpop.f32.mrf.mxu0 }
 0x17f   : > { %v1631_v8 = vadd.f32 %v1190_v38, %v556_v7  ;;  %v600_v9 = vsel %vm586_vm4, %v1626_v5, 0.0 }
 0x180   : > { %627 = vadd.xlane.f32.xlu0 %v600_v9  ;;  %v1274_v10 = vpop.f32.mrf.mxu0 }
 0x181   : > { %2044 = vst [vmem:[#allocation17_spill] sm:$0xff] %v1631_v8  ;;  %v1636_v11 = vadd.f32 %v1274_v10, %v1190_v38  ;;  %v598_v14 = vsel %vm586_vm4, %v1631_v8, 0.0 }
 0x182   : > { %621 = vadd.xlane.f32.xlu1 %v597_v12  ;;  %v569_v13 = vpop.f32.mrf.mxu0 }
 0x183   : > { %v1644_v16 = vadd.f32 %v1190_v38, %v569_v13  ;;  %v603_v18 = vsel %vm586_vm4, %v1636_v11, 0.0 }
 0x184   : > { %623 = vadd.xlane.f32.xlu0 %v598_v14  ;;  %v1275_v15 = vpop.f32.mrf.mxu0 }
 0x185   : > { %v1646_v17 = vadd.f32 %v1275_v15, %v1190_v38  ;;  %v601_v22 = vsel %vm586_vm4, %v1644_v16, 0.0 }
 0x186   : > { %633 = vadd.xlane.f32.xlu1 %v603_v18  ;;  %v572_v19 = vpop.f32.mrf.mxu0 }
 0x187   : > { %v1651_v20 = vadd.f32 %v1190_v38, %v572_v19  ;;  %v604_v21 = vsel %vm586_vm4, %v1646_v17, 0.0 }
 0x188   : > { %635 = vadd.xlane.f32.xlu0 %v604_v21 }
 0x189   : > { %v602_v23 = vsel %vm586_vm4, %v1651_v20, 0.0 }
 0x18a   : > { %629 = vadd.xlane.f32.xlu1 %v601_v22 }
 0x18c   : > { %631 = vadd.xlane.f32.xlu0 %v602_v23 }
 0x19b   : > { %685 = vperm.xlu1 %1338, %v1533_v35   ;;  %v1682_v35 = vpop.permute.xlu0 %670 }
 0x19c   : > { %vm697_vm15 = vcmp.eq.s32.totalorder %v1682_v35, %v1576_v37 }
 0x19f   : > { %v1686_v33 = vpop.permute.xlu0 %676 }
 0x1a0   : > { %vm699_vm4 = vcmp.eq.s32.totalorder %v1686_v33, %v1576_v37 }
 0x1a2   : > { %682 = vperm.xlu0 %1337, %v1536_v36   ;;  %v1684_v36 = vpop.permute.xlu1 %667 }
 0x1a3   : > { %vm696_vm0 = vcmp.eq.s32.totalorder %v1684_v36, %v1576_v37 }
 0x1a6   : > { %v1688_v38 = vpop.permute.xlu1 %673 }
 0x1a7   : > { %vm698_vm1 = vcmp.eq.s32.totalorder %v1688_v38, %v1576_v37 }
 0x1aa   : > { %v1692_v42 = vpop.permute.xlu1 %679 }
 0x1ab   : > { %vm700_vm2 = vcmp.eq.s32.totalorder %v1692_v42, %v1576_v37 }
 0x1f5   : > { %v1690_v39 = vpop.xlane.xlu0 %609 }
 0x1f6   : > { %v712_v0 = vsel %vm2034_vm7, %v1690_v39, -3e+38  ;;  %vm766_vm7 = vcmask 32768  }
 0x1f7   : > { %v729_v9 = vsel %vm726_vm10, %v712_v0, -inf }
 0x1f9   : > { %v1694_v44 = vpop.xlane.xlu0 %605 }
 0x1fa   : > { %2045 = vst [vmem:[#allocation18_spill] sm:$0xff] %v1694_v44  ;;  %v710_v1 = vsel %vm2031_vm5, %v1694_v44, -3e+38 }
 0x1fb   : > { %v1696_v45 = vpop.xlane.xlu1 %607  ;;  %v727_v10 = vsel %vm726_vm10, %v710_v1, -inf }
 0x1fc   : > { %v711_v2 = vsel %vm688_vm6, %v1696_v45, -3e+38 }
 0x1fd   : > { %v1698_v46 = vpop.xlane.xlu0 %611  ;;  %v728_v12 = vsel %vm726_vm10, %v711_v2, -inf }
 0x1fe   : > { %v713_v13 = vsel %vm690_vm9, %v1698_v46, -3e+38 }
 0x1ff   : > { %v1700_v49 = vpop.xlane.xlu1 %617 }
 0x200   : > { %v716_v6 = vsel %vm693_vm11, %v1700_v49, -3e+38 }
 0x201   : > { %v1702_v50 = vpop.xlane.xlu0 %619  ;;  %v735_v22 = vsel %vm726_vm10, %v716_v6, -inf }
 0x202   : > { %v717_v15 = vsel %vm694_vm14, %v1702_v50, -3e+38  ;;  %v736_v60 = vmax.f32 %v729_v9, %v735_v22 }
 0x203   : > { %v1704_v52 = vpop.xlane.xlu1 %613  ;;  %v737_v41 = vsel %vm726_vm10, %v717_v15, -inf }
 0x204   : > { %v714_v18 = vsel %vm691_vm8, %v1704_v52, -3e+38 }
 0x205   : > { %v1706_v53 = vpop.xlane.xlu0 %615  ;;  %v731_v34 = vsel %vm726_vm10, %v714_v18, -inf }
 0x206   : > { %v715_v7 = vsel %vm692_vm12, %v1706_v53, -3e+38 }
 0x207   : > { %v1708_v54 = vpop.xlane.xlu1 %625  ;;  %v733_v23 = vsel %vm726_vm10, %v715_v7, -inf  ;;  %v730_v7 = vsel %vm726_vm10, %v713_v13, -inf }
 0x208   : > { %v720_v0 = vsel %vm697_vm15, %v1708_v54, -3e+38  ;;  %v734_v48 = vmax.f32 %v728_v12, %v733_v23  ;;  %v732_v12 = vmax.f32 %v727_v10, %v731_v34 }
 0x209   : > { %v1710_v55 = vpop.xlane.xlu0 %627  ;;  %v743_v40 = vsel %vm726_vm10, %v720_v0, -inf }
 0x20a   : > { %v721_v1 = vsel %vm698_vm1, %v1710_v55, -3e+38  ;;  %v744_v51 = vmax.f32 %v736_v60, %v743_v40 }
 0x20b   : > { %v1712_v58 = vpop.xlane.xlu1 %621  ;;  %v745_v13 = vsel %vm726_vm10, %v721_v1, -inf }
 0x20c   : > { %v718_v2 = vsel %vm695_vm13, %v1712_v58, -3e+38 }
 0x20d   : > { %v1714_v59 = vpop.xlane.xlu0 %623  ;;  %v739_v15 = vsel %vm726_vm10, %v718_v2, -inf  ;;  %v2046_v2 = vlaneseq }
 0x20e   : > { %v719_v19 = vsel %vm696_vm0, %v1714_v59, -3e+38  ;;  %v740_v44 = vmax.f32 %v732_v12, %v739_v15  ;;  %v764_v15 = vld [vmem:[#allocation2] sm:$0x1] }
 0x20f   : > { %v1716_v61 = vpop.xlane.xlu1 %633  ;;  %v741_v43 = vsel %vm726_vm10, %v719_v19, -inf  ;;  %v738_v19 = vmax.f32 %v730_v7, %v737_v41 }
 0x210   : > { %v742_v23 = vmax.f32 %v734_v48, %v741_v43 }
 0x211   : > { %v1722_v62 = vpop.xlane.xlu0 %635  ;;  %v746_v8 = vmax.f32 %v738_v19, %v745_v13 }
 0x213   : > { %v1744_v3 = vpop.xlane.xlu1 %629 }
 0x214   : > { %v722_v47 = vsel %vm699_vm4, %v1744_v3, -3e+38 }
 0x215   : > { %v1773_v14 = vpop.xlane.xlu0 %631  ;;  %v747_v57 = vsel %vm726_vm10, %v722_v47, -inf }
 0x216   : > { %v723_v6 = vsel %vm700_vm2, %v1773_v14, -3e+38  ;;  %v748_v41 = vmax.f32 %v740_v44, %v747_v57 }
 0x217   : > { %v686_v21 = vpop.permute.xlu1 %685  ;;  %v749_v18 = vsel %vm726_vm10, %v723_v6, -inf  ;;  %v1833_v6 = vshrl.u32 %v2046_v2, 7 }
 0x218   : > { %vm702_vm3 = vcmp.eq.s32.totalorder %v686_v21, %v1576_v37  ;;  %v750_v9 = vmax.f32 %v742_v23, %v749_v18 }
 0x219   : > { %v725_v56 = vsel %vm702_vm3, %v1722_v62, -3e+38  ;;  %v803_v18 = vsub.s32 0, %v1833_v6 }
 0x21a   : > { %v753_v4 = vsel %vm726_vm10, %v725_v56, -inf  ;;  %v755_v48 = vmax.f32 %v748_v41, %v750_v9 }
 0x21b   : > { %v754_v34 = vmax.f32 %v746_v8, %v753_v4  ;;  %v2047_v4 = vmov 0.0  }
 0x21c   : > { %v1218_v8 = vsel %vm702_vm3, 1.0, %v2047_v4  ;;  %v1216_v23 = vsel %vm700_vm2, 1.0, %v2047_v4  ;;  %v1214_v21 = vsel %vm698_vm1, 1.0, %v2047_v4  ;;  %v1215_v38 = vsel %vm699_vm4, 1.0, %v2047_v4 }
 0x21d   : > { %v683_v0 = vpop.permute.xlu0 %682  ;;  %v1210_v36 = vsel %vm694_vm14, 1.0, %v2047_v4  ;;  %v1213_v33 = vsel %vm697_vm15, 1.0, %v2047_v4  ;;  %v1208_v32 = vsel %vm692_vm12, 1.0, %v2047_v4  ;;  %v1211_v35 = vsel %vm695_vm13, 1.0, %v2047_v4 }
 0x21e   : > { %vm701_vm5 = vcmp.eq.s32.totalorder %v683_v0, %v1576_v37  ;;  %v1206_v30 = vsel %vm690_vm9, 1.0, %v2047_v4  ;;  %v1209_v31 = vsel %vm693_vm11, 1.0, %v2047_v4  ;;  %v1204_v28 = vsel %vm688_vm6, 1.0, %v2047_v4 }
 0x21f   : > { %v724_v22 = vsel %vm701_vm5, %v1716_v61, -3e+38  ;;  %v1217_v44 = vsel %vm701_vm5, 1.0, %v2047_v4  ;;  %v1207_v29 = vsel %vm691_vm8, 1.0, %v2047_v4  ;;  %vm2048_vm5 = vcmp.eq.s32.totalorder %v1668_v26, %v1576_v37 }
 0x220   : > { %v751_v1 = vsel %vm726_vm10, %v724_v22, -inf  ;;  %v1205_v25 = vsel %vm2048_vm5, 1.0, %v2047_v4  ;;  %vm2049_vm6 = vcmp.eq.s32.totalorder %v1664_v24, %v1576_v37  ;;  %vm1019_vm9 = vcmask 1044480  }
 0x221   : > { %v752_v43 = vmax.f32 %v744_v51, %v751_v1 }
 0x223   : > { %v756_v40 = vmax.f32 %v752_v43, %v754_v34  ;;  %v1212_v43 = vsel %vm696_vm0, 1.0, %v2047_v4 }
 0x225   : > { %v757_v60 = vmax.f32 %v755_v48, %v756_v40 }
 0x227   : > { %v758_v47 = vrot.slane %v757_v60, 4 }
 0x229   : > { %v759_v10 = vmax.f32 %v757_v60, %v758_v47 }
 0x22b   : > { %v760_v56 = vrot.slane %v759_v10, 2 }
 0x22d   : > { %v761_v7 = vmax.f32 %v759_v10, %v760_v56 }
 0x22f   : > { %v762_v13 = vrot.slane %v761_v7, 1 }
 0x231   : > { %v763_v19 = vmax.f32 %v761_v7, %v762_v13 }
 0x233   : > { %v765_v12 = vmax.f32 %v764_v15, %v763_v19 }
 0x235   : > { %767 = vst.msk [vmem:[#allocation2] sm:$0x1] %vm766_vm7, %v765_v12  ;;  %v1836_v57 = vrot.slane %v765_v12, %v803_v18  ;;  %v1004_v51 = vsub.f32 %v764_v15, %v765_v12  ;;  %vm1417_vm7 = vmmov 0  }
 0x236   : > { %1308 = vmatprep.mubr.msk.f32.mxu1 %vm1417_vm7, %v2047_v4 }
 0x237   : > { %v1005_v9 = vmul.f32 1.442695, %v1004_v51  ;;  %v821_v22 = vmul.f32 %v1218_v8, %v1836_v57  ;;  %v820_v1 = vmul.f32 %v1217_v44, %v1836_v57  ;;  %v819_v41 = vmul.f32 %v1216_v23, %v1836_v57 }
 0x238   : > { %v817_v42 = vmul.f32 %v1214_v21, %v1836_v57  ;;  %v818_v60 = vmul.f32 %v1215_v38, %v1836_v57  ;;  %v815_v47 = vmul.f32 %v1212_v43, %v1836_v57  ;;  %v816_v2 = vmul.f32 %v1213_v33, %v1836_v57 }
 0x239   : > { %1341 = vpow2.f32 %v1005_v9  ;;  %v867_v0 = vsel %vm726_vm10, %v821_v22, 0.0  ;;  %v864_v34 = vsel %vm726_vm10, %v820_v1, 0.0  ;;  %v861_v48 = vsel %vm726_vm10, %v819_v41, 0.0 }
 0x23a   : > { %868 = vadd.xlane.f32.xlu0 %v867_v0  ;;  %865 = vadd.xlane.f32.xlu1 %v864_v34  ;;  %v855_v40 = vsel %vm726_vm10, %v817_v42, 0.0  ;;  %v858_v10 = vsel %vm726_vm10, %v818_v60, 0.0  ;;  %v849_v56 = vsel %vm726_vm10, %v815_v47, 0.0  ;;  %v813_v7 = vmul.f32 %v1210_v36, %v1836_v57 }
 0x23b   : > { %v852_v13 = vsel %vm726_vm10, %v816_v2, 0.0  ;;  %v814_v19 = vmul.f32 %v1211_v35, %v1836_v57  ;;  %v811_v12 = vmul.f32 %v1208_v32, %v1836_v57  ;;  %v812_v9 = vmul.f32 %v1209_v31, %v1836_v57 }
 0x23c   : > { %v843_v15 = vsel %vm726_vm10, %v813_v7, 0.0  ;;  %v809_v22 = vmul.f32 %v1206_v30, %v1836_v57  ;;  %v810_v21 = vmul.f32 %v1207_v29, %v1836_v57  ;;  %v807_v41 = vmul.f32 %v1204_v28, %v1836_v57 }
 0x23d   : > { %v846_v44 = vsel %vm726_vm10, %v814_v19, 0.0  ;;  %v837_v23 = vsel %vm726_vm10, %v811_v12, 0.0  ;;  %v808_v34 = vmul.f32 %v1205_v25, %v1836_v57  ;;  %v1203_v42 = vsel %vm2049_vm6, 1.0, %v2047_v4 }
 0x23e   : > { %862 = vadd.xlane.f32.xlu0 %v861_v48  ;;  %856 = vadd.xlane.f32.xlu1 %v855_v40  ;;  %v831_v1 = vsel %vm726_vm10, %v809_v22, 0.0  ;;  %v834_v0 = vsel %vm726_vm10, %v810_v21, 0.0  ;;  %v825_v27 = vsel %vm726_vm10, %v807_v41, 0.0  ;;  %v806_v38 = vmul.f32 %v1203_v42, %v1836_v57 }
 0x23f   : > { %v828_v43 = vsel %vm726_vm10, %v808_v34, 0.0 }
 0x240   : > { %v822_v26 = vsel %vm726_vm10, %v806_v38, 0.0 }
 0x242   : > { %859 = vadd.xlane.f32.xlu0 %v858_v10  ;;  %850 = vadd.xlane.f32.xlu1 %v849_v56 }
 0x246   : > { %v1342_v51 = vpop.eup %1341  ;;  %853 = vadd.xlane.f32.xlu0 %v852_v13  ;;  %844 = vadd.xlane.f32.xlu1 %v843_v15 }
 0x247   : > { %v1894_v8 = vrot.slane %v1342_v51, %v803_v18  ;;  %v840_v18 = vsel %vm726_vm10, %v812_v9, 0.0 }
 0x24a   : > { %847 = vadd.xlane.f32.xlu0 %v846_v44  ;;  %838 = vadd.xlane.f32.xlu1 %v837_v23 }
 0x24e   : > { %841 = vadd.xlane.f32.xlu0 %v840_v18  ;;  %832 = vadd.xlane.f32.xlu1 %v831_v1 }
 0x252   : > { %835 = vadd.xlane.f32.xlu0 %v834_v0  ;;  %826 = vadd.xlane.f32.xlu1 %v825_v27 }
 0x256   : > { %829 = vadd.xlane.f32.xlu0 %v828_v43 }
 0x25a   : > { %823 = vadd.xlane.f32.xlu0 %v822_v26 }
 0x2c3   : > { %v869_v48 = vpop.xlane.xlu0 %868  ;;  %v866_v40 = vpop.xlane.xlu1 %865 }
 0x2c4   : > { %v885_v60 = vsub.f32 %v1722_v62, %v869_v48  ;;  %v884_v47 = vsub.f32 %v1716_v61, %v866_v40 }
 0x2c6   : > { %v916_v24 = vmul.f32 1.442695, %v885_v60  ;;  %v914_v36 = vmul.f32 1.442695, %v884_v47  ;;  %v2050_v47 = vld [vmem:[#allocation18_spill] sm:$0xff] }
 0x2c7   : > { %v863_v33 = vpop.xlane.xlu0 %862  ;;  %v857_v10 = vpop.xlane.xlu1 %856 }
 0x2c8   : > { %1343 = vpow2.f32 %v916_v24  ;;  %v883_v57 = vsub.f32 %v1773_v14, %v863_v33  ;;  %v881_v56 = vsub.f32 %v1710_v55, %v857_v10  ;;  %v2052_v10 = vld [vmem:[#allocation16_spill] sm:$0xff] }
 0x2c9   : > { %1345 = vpow2.f32 %v914_v36 }
 0x2ca   : > { %v912_v2 = vmul.f32 1.442695, %v883_v57  ;;  %v908_v7 = vmul.f32 1.442695, %v881_v56  ;;  %v2053_v56 = vld [vmem:[#allocation14_spill] sm:$0xff] }
 0x2cb   : > { %v860_v32 = vpop.xlane.xlu0 %859  ;;  %v851_v35 = vpop.xlane.xlu1 %850 }
 0x2cc   : > { %1347 = vpow2.f32 %v912_v2  ;;  %v882_v13 = vsub.f32 %v1744_v3, %v860_v32  ;;  %v879_v62 = vsub.f32 %v1714_v59, %v851_v35  ;;  %v2054_v32 = vld [vmem:[#allocation12_spill] sm:$0xff] }
 0x2cd   : > { %1349 = vpow2.f32 %v908_v7 }
 0x2ce   : > { %v910_v61 = vmul.f32 1.442695, %v882_v13  ;;  %v904_v15 = vmul.f32 1.442695, %v879_v62  ;;  %v2055_v62 = vld [vmem:[#allocation15_spill] sm:$0xff] }
 0x2cf   : > { %v854_v19 = vpop.xlane.xlu0 %853  ;;  %v845_v12 = vpop.xlane.xlu1 %844 }
 0x2d0   : > { %1351 = vpow2.f32 %v910_v61  ;;  %v880_v14 = vsub.f32 %v1708_v54, %v854_v19  ;;  %v877_v55 = vsub.f32 %v1702_v50, %v845_v12  ;;  %v2056_v19 = vld [vmem:[#allocation13_spill] sm:$0xff] }
 0x2d1   : > { %1353 = vpow2.f32 %v904_v15 }
 0x2d2   : > { %v906_v51 = vmul.f32 1.442695, %v880_v14  ;;  %v900_v30 = vmul.f32 1.442695, %v877_v55  ;;  %v2057_v55 = vld [vmem:[#allocation10_spill] sm:$0xff] }
 0x2d3   : > { %v848_v31 = vpop.xlane.xlu0 %847  ;;  %v839_v44 = vpop.xlane.xlu1 %838 }
 0x2d4   : > { %1355 = vpow2.f32 %v906_v51  ;;  %v878_v3 = vsub.f32 %v1712_v58, %v848_v31  ;;  %v875_v59 = vsub.f32 %v1706_v53, %v839_v44  ;;  %v2058_v31 = vld [vmem:[#allocation8_spill] sm:$0xff] }
 0x2d5   : > { %v1344_v23 = vpop.eup %1343  ;;  %1357 = vpow2.f32 %v900_v30 }
 0x2d6   : > { %v1346_v9 = vpop.eup %1345  ;;  %v902_v22 = vmul.f32 1.442695, %v878_v3  ;;  %v933_v28 = vmul.f32 %v1344_v23, %v1646_v17  ;;  %v896_v29 = vmul.f32 1.442695, %v875_v59  ;;  %v1201_v3 = vld [vmem:[%s268_s26] ss:$0 sm:$0xff] }
 0x2d7   : > { %v842_v54 = vpop.xlane.xlu0 %841  ;;  %v833_v18 = vpop.xlane.xlu1 %832  ;;  %v932_v21 = vmul.f32 %v1346_v9, %v1636_v11  ;;  %v2059_v59 = vld [vmem:[#allocation11_spill] sm:$0xff]  ;;  %vm707_vm8 = vcmp.eq.s32.totalorder %v1201_v3, %v1833_v6 }
 0x2d8   : > { %1359 = vpow2.f32 %v902_v22  ;;  %v876_v50 = vsub.f32 %v1700_v49, %v842_v54  ;;  %v873_v1 = vsub.f32 %v1698_v46, %v833_v18  ;;  %1277 = vmatpush3.msra.mxu1 %v933_v28  ;;  %v2060_v22 = vld [vmem:[#allocation9_spill] sm:$0xff]  ;;  %v1007_v54 = vld [vmem:[#allocation4] sm:$0x1f]  ;;  %v1418_v18 = vmov 1.0  }
 0x2d9   : > { %v1348_v58 = vpop.eup %1347  ;;  %1278 = vmatprep.subr.mxu1 %v2047_v4  ;;  %1361 = vpow2.f32 %v896_v29  ;;  %v1015_v29 = vld [vmem:[#allocation3] sm:$0x1f] }
 0x2da   : > { %v898_v53 = vmul.f32 1.442695, %v876_v50  ;;  %1279 = vmatpush3.msra.mxu1 %v932_v21  ;;  %v931_v41 = vmul.f32 %v1348_v58, %v1651_v20  ;;  %v892_v17 = vmul.f32 1.442695, %v873_v1  ;;  %v1350_v27 = vpop.eup %1349  ;;  %v1014_v50 = vmul.f32 %v1894_v8, %v1007_v54 }
 0x2db   : > { %1280 = vmatprep.subr.mxu1 %v2047_v4  ;;  %v836_v25 = vpop.xlane.xlu0 %835  ;;  %v827_v0 = vpop.xlane.xlu1 %826  ;;  %v929_v48 = vmul.f32 %v1350_v27, %v1626_v5 }
 0x2dc   : > { %1363 = vpow2.f32 %v898_v53  ;;  %v874_v46 = vsub.f32 %v1704_v52, %v836_v25  ;;  %v871_v49 = vsub.f32 %v1696_v45, %v827_v0  ;;  %1281 = vmatpush3.msra.mxu1 %v931_v41 }
 0x2dd   : > { %v1352_v11 = vpop.eup %1351  ;;  %1282 = vmatprep.subr.mxu1 %v2047_v4  ;;  %1365 = vpow2.f32 %v892_v17 }
 0x2de   : > { %v894_v34 = vmul.f32 1.442695, %v874_v46  ;;  %v930_v42 = vmul.f32 %v1352_v11, %v1644_v16  ;;  %v888_v20 = vmul.f32 1.442695, %v871_v49  ;;  %v1354_v38 = vpop.eup %1353 }
 0x2df   : > { %v830_v43 = vpop.xlane.xlu0 %829 }
 0x2e0   : > { %1367 = vpow2.f32 %v894_v34  ;;  %v872_v26 = vsub.f32 %v1690_v39, %v830_v43  ;;  %1283 = vmatpush3.msra.mxu1 %v930_v42  ;;  %v2051_v39 = vld [vmem:[#allocation17_spill] sm:$0xff] }
 0x2e1   : > { %v1356_v52 = vpop.eup %1355  ;;  %1284 = vmatprep.subr.mxu1 %v2047_v4  ;;  %1369 = vpow2.f32 %v888_v20  ;;  %v927_v36 = vmul.f32 %v1354_v38, %v2051_v39 }
 0x2e2   : > { %v890_v45 = vmul.f32 1.442695, %v872_v26  ;;  %1285 = vmatpush3.msra.mxu1 %v929_v48  ;;  %v928_v40 = vmul.f32 %v1356_v52, %v1616_v63  ;;  %v1358_v60 = vpop.eup %1357 }
 0x2e3   : > { %1286 = vmatprep.subr.mxu1 %v2047_v4  ;;  %v824_v16 = vpop.xlane.xlu0 %823  ;;  %v925_v2 = vmul.f32 %v1358_v60, %v2053_v56 }
 0x2e4   : > { %1371 = vpow2.f32 %v890_v45  ;;  %v870_v24 = vsub.f32 %v2050_v47, %v824_v16  ;;  %1287 = vmatpush3.msra.mxu1 %v928_v40 }
 0x2e5   : > { %v1360_v33 = vpop.eup %1359  ;;  %1288 = vmatprep.subr.mxu1 %v2047_v4 }
 0x2e6   : > { %v886_v5 = vmul.f32 1.442695, %v870_v24  ;;  %1289 = vmatpush3.msra.mxu1 %v927_v36  ;;  %v926_v57 = vmul.f32 %v1360_v33, %v2052_v10  ;;  %v1362_v63 = vpop.eup %1361 }
 0x2e7   : > { %1290 = vmatprep.subr.mxu1 %v2047_v4  ;;  %v923_v61 = vmul.f32 %v1362_v63, %v2055_v62 }
 0x2e8   : > { %1373 = vpow2.f32 %v886_v5  ;;  %1291 = vmatpush3.msra.mxu1 %v926_v57 }
 0x2e9   : > { %v1364_v7 = vpop.eup %1363  ;;  %1292 = vmatprep.subr.mxu1 %v2047_v4 }
 0x2ea   : > { %1293 = vmatpush3.msra.mxu1 %v925_v2  ;;  %v924_v35 = vmul.f32 %v1364_v7, %v2054_v32  ;;  %v1366_v13 = vpop.eup %1365 }
 0x2eb   : > { %1294 = vmatprep.subr.mxu1 %v2047_v4  ;;  %v921_v51 = vmul.f32 %v1366_v13, %v2057_v55 }
 0x2ec   : > { %1295 = vmatpush3.msra.mxu1 %v924_v35 }
 0x2ed   : > { %v1368_v15 = vpop.eup %1367  ;;  %1296 = vmatprep.subr.mxu1 %v2047_v4 }
 0x2ee   : > { %1297 = vmatpush3.msra.mxu1 %v923_v61  ;;  %v922_v12 = vmul.f32 %v1368_v15, %v2056_v19  ;;  %v1370_v14 = vpop.eup %1369 }
 0x2ef   : > { %1298 = vmatprep.subr.mxu1 %v2047_v4  ;;  %v919_v23 = vmul.f32 %v1370_v14, %v2059_v59 }
 0x2f0   : > { %1299 = vmatpush3.msra.mxu1 %v922_v12 }
 0x2f1   : > { %v1372_v30 = vpop.eup %1371  ;;  %1300 = vmatprep.subr.mxu1 %v2047_v4 }
 0x2f2   : > { %1301 = vmatpush3.msra.mxu1 %v921_v51  ;;  %v920_v44 = vmul.f32 %v1372_v30, %v2058_v31 }
 0x2f3   : > { %1302 = vmatprep.subr.mxu1 %v2047_v4 }
 0x2f4   : > { %1303 = vmatpush3.msra.mxu1 %v920_v44 }
 0x2f5   : > { %v1374_v9 = vpop.eup %1373  ;;  %1304 = vmatprep.subr.mxu1 %v2047_v4 }
 0x2f6   : > { %1305 = vmatpush3.msra.mxu1 %v919_v23  ;;  %v918_v28 = vmul.f32 %v1374_v9, %v2060_v22 }
 0x2f7   : > { %1306 = vmatprep.subr.mxu1 %v2047_v4 }
 0x2f8   : > { %1307 = vmatpush3.msra.mxu1 %v918_v28 }
 0x2f9   : > { %1309 = vmatmul.mubr.msk.f32.vlgmr.msra.gmra.mxu1 %vm707_vm8, %v1418_v18  ;;  %1311 = vmatprep.subr.mxu1 %v2047_v4 }
 0x2fa   : > { %1312 = vmatpush3.msk.msra.mxu1 %vm1019_vm9, %v1015_v29  ;;  %1313 = vmatprep.mubr.msk.f32.mxu1 %vm1417_vm7, %v2047_v4 }
 0x2fd   : > { %1314 = vmatmul.mubr.msk.f32.vlgmr.msra.gmra.mxu1 %vm726_vm10, %v1014_v50 }
 0x3b9   : > { %v1000_v6 = vpop.f32.mrf.mxu1 }
 0x3bb   : > { %v1310_v1 = vpop.f32.mrf.mxu1 }
 0x3bc   : > { %1097 = sbr.rel (%p1222_p7) target bundleno = 1133 (0x46d), region = 48 }
 0x3bd   : > { %v1089_v21 = vpop.f32.mrf.mxu1 }
 0x3be   : > { %v1090_v58 = vadd.f32 %v1089_v21, %v1000_v6 }
 0x3bf   : > { %v1315_v53 = vpop.f32.mrf.mxu1 }
 0x3c0   : > { %1093 = vst [vmem:[#allocation3] sm:$0x1f] %v1090_v58 }
 0x3c1   : > { %vm1099_vm11 = vcmp.eq.s32.totalorder %v1576_v37, 33 }
 0x3c7   : > { %v1098_v41 = vld [vmem:[#allocation3] sm:$0x1f] }
 0x3c8   : > { %v1102_v17 = vsel %vm1099_vm11, %v1098_v41, 0.0 }
 0x3c9   : > { %v1103_v25 = vsel %vm1019_vm9, %v1102_v17, 0.0 }
 0x3ca   : > { %1104 = vadd.xlane.f32.xlu0 %v1103_v25 }
 0x453   : > { %v1105_v4 = vpop.xlane.xlu0 %1104 }
 0x454   : > { %v1106_v8 = vadd.f32 1e-16, %v1105_v4 }
 0x456   : > { %1375 = vrcp.f32 %v1106_v8 }
 0x463   : > { %v1376_v0 = vpop.eup %1375 }
 0x464   : > { %v1108_v27 = vmul.f32 %v1376_v0, %v1106_v8 }
 0x466   : > { %v1109_v46 = vsub.f32 2.0, %v1108_v27 }
 0x468   : > { %v1110_v49 = vmul.f32 %v1376_v0, %v1109_v46 }
 0x46a   : > { %v1111_v11 = vmul.f32 %v1110_v49, %v1098_v41 }
 0x46c   : > { %1112 = vst [vmem:[#allocation5] sm:$0x1f] %v1111_v11 }
 0x46d PF: > { %p1320_p8 = scmp.eq.s32.totalorder %s1456_s19, 2  ;;  %s1419_s17 = smov [#allocation5]  }
 0x46e   : > { %s1120_s20 = sshll.u32 %s1419_s17, 4  ;;  %s1121_s20 = int_to_ptr.vmem [resolvable:$true] %s1120_s20 }
 0x46f   : > { %s1377_s21 = scalar_lea.vmem %s1121_s20, 128  ;;  %p1384_p12 = scmp.lt.s32.totalorder %s1121_s20, %s1121_s20 }
 0x470   : > { %p1378_p9 = scmp.ne.s32.totalorder %s1121_s20, %s1377_s21  ;;  %p1385_p13 = scmp.lt.s32.totalorder %s1377_s21, %s1377_s21 }
 0x472   : > { %p1379_p10 = pnand %p1378_p9, %p1320_p8  ;;  %p1386_p0 = por %p1385_p13, %p1384_p12 }
 0x474   : > { %p1380_p11 = pneg %p1379_p10 }
 0x476   : > { %p1387_p1 = pnand %p1386_p0, %p1380_p11 }
 0x478   : > { %1390 = shalt.err (!%p1387_p1)
}
 0x479   : > { %1317 = dma.vmem_to_hbm [thread:$0]  (%p1320_p8), %s1121_s20, 128, %s2018_s5, [#allocation6]  }
 0x47a   : > { %1406 = dma.done.wait (%p1320_p8), [#allocation6], 128  }
 0x47b   : > { %1408 = vsyncadd (%p1320_p8), [#allocation6], 4294967168 }
 0x47c PF: > { %s16_s18 = sadd.s32 1, %s1411_s18  }
 0x47d   : > { %p13_p2 = scmp.ge.s32.totalorder %s16_s18, 5  }
 0x47f   :  { %15 = sbr.rel (!%p13_p2) target bundleno = 1 (0x1), region = 81 }
 0x484   :  { %1133 = vsyncpa [#allocation6], 1 }
 0x485   :  { %1135 = vsyncpa [#allocation6 + $0x1], 1 }

</bundles_post_ra>
